<compile_context>
chip_gen: v5e
topology: v5e:2x2
jax: 0.10.0
libtpu: 0.0.40
codegen_flags: <defaults>
</compile_context>

<pallas_src>
import math

import jax
import jax.numpy as jnp
import numpy as np
from jax.experimental import pallas as pl
from jax.experimental.pallas import tpu as pltpu


def _round_up(x, m):
    return (x + m - 1) // m * m


def _m2k_kernel(m_ref, kt_ref, o_ref):
    """One grid step == one batch tile.

    m_ref  : (TM, PP)  flattened (and zero-padded) moment matrices
    kt_ref : (PP, PP)  padded kron(invM0, invM1, ...)^T, constant across steps
    o_ref  : (TM, PP)  flattened kernel output
    """
    o_ref[...] = jnp.dot(m_ref[...], kt_ref[...], preferred_element_type=jnp.float32)


def _moment_inverses(shape):
    """Per-axis M / invM exactly as in the PyTorch _MK.__init__ (float64 on host)."""
    invMs = []
    for l in shape:
        M = np.zeros((l, l), dtype=np.float64)
        for i in range(l):
            M[i] = (np.arange(l) - (l - 1) // 2) ** i / math.factorial(i)
        invMs.append(np.linalg.inv(M))
    return invMs


class M2K:
    """Pallas-backed equivalent of the PyTorch M2K module."""

    def __init__(self, shape):
        self.shape = tuple(int(s) for s in shape)
        invMs_np = _moment_inverses(self.shape)
        # Fold the per-axis left-dots into a single Kronecker matrix (constant).
        K = invMs_np[0]
        for A in invMs_np[1:]:
            K = np.kron(K, A)
        self.P = int(np.prod(self.shape))          # flattened kernel size
        self.PP = _round_up(self.P, 128)           # lane-dense padded size
        # out_row = m_row @ K^T ; pad to (PP, PP) so the MXU contraction and the
        # output lanes are 128-aligned (extra rows/cols are zero => no effect).
        kt = np.zeros((self.PP, self.PP), dtype=np.float64)
        kt[: self.P, : self.P] = K.T
        self.kt_pad = jnp.asarray(kt, jnp.float32)
        self.invMs = [jnp.asarray(A, jnp.float32) for A in invMs_np]  # for reference

    def __call__(self, m):
        orig_shape = m.shape
        assert m.ndim >= len(self.shape)
        P, PP = self.P, self.PP
        m_flat = m.reshape(-1, P).astype(jnp.float32)   # fold all batch dims into M
        B = m_flat.shape[0]

        # Batch tiling: single full block for small B, 256-row tiles otherwise.
        TM = 256
        if B <= TM:
            BP = _round_up(B, 8)
            tm = BP
        else:
            BP = _round_up(B, TM)
            tm = TM

        m_pad = jnp.pad(m_flat, ((0, BP - B), (0, PP - P)))

        out = pl.pallas_call(
            _m2k_kernel,
            out_shape=jax.ShapeDtypeStruct((BP, PP), jnp.float32),
            grid_spec=pltpu.PrefetchScalarGridSpec(
                num_scalar_prefetch=0,
                grid=(BP // tm,),
                in_specs=[
                    pl.BlockSpec((tm, PP), lambda i: (i, 0)),
                    pl.BlockSpec((PP, PP), lambda i: (0, 0)),
                ],
                out_specs=pl.BlockSpec((tm, PP), lambda i: (i, 0)),
            ),
            compiler_params=pltpu.CompilerParams(
                dimension_semantics=("parallel",),
            ),
        )(m_pad, self.kt_pad)

        return out[:B, :P].reshape(orig_shape)


# ---------------- pure-JAX reference (independent per-axis tensordot path) ----------------
def m2k_reference(m, invMs):
    k = len(invMs)
    x = m.astype(jnp.float32)
    for j, A in enumerate(invMs):
        axis = m.ndim - k + j
        x = jnp.tensordot(A, x, axes=([1], [axis]))   # contracted axis becomes axis 0
        x = jnp.moveaxis(x, 0, axis)
    return x


if __name__ == "__main__":
    shape = (5, 5)                       # matches the docstring usage: M2K([5, 5])
    m2k = M2K(shape)

    key = jax.random.PRNGKey(0)
    m = jax.random.normal(key, (2, 4, 5, 5), jnp.float32)   # [..., *shape]

    out = jax.block_until_ready(m2k(m))
    assert out.shape == m.shape, out.shape

    ref = jax.block_until_ready(m2k_reference(m, m2k.invMs))
    err = float(jnp.max(jnp.abs(out - ref)))
    assert err < 1e-3, f"max abs error too large: {err}"

    # Also exercise the no-batch-dim path (_packdim equivalent).
    m2 = jax.random.normal(jax.random.PRNGKey(1), shape, jnp.float32)
    out2 = jax.block_until_ready(m2k(m2))
    ref2 = jax.block_until_ready(m2k_reference(m2, m2k.invMs))
    err2 = float(jnp.max(jnp.abs(out2 - ref2)))
    assert out2.shape == shape and err2 < 1e-3, err2

    print("KERNEL_OK")
</pallas_src>

<mosaic_0001>
module attributes {stable_mosaic.version = 11 : i64} {
  func.func @_m2k_kernel(%arg0: i32, %arg1: memref<8x128xf32, #tpu.memory_space<vmem>>, %arg2: memref<128x128xf32, #tpu.memory_space<vmem>>, %arg3: memref<8x128xf32, #tpu.memory_space<vmem>>) attributes {dimension_semantics = [#tpu.dimension_semantics<parallel>], iteration_bounds = array<i64: 1>, scalar_prefetch = 0 : i64, scratch_operands = 0 : i64, tpu.core_type = #tpu.core_type<tc>, window_params = [{transform_indices = @transform_0, window_bounds = array<i64: 8, 128>}, {pipeline_mode = #tpu.pipeline_mode<synchronous>, transform_indices = @transform_1, window_bounds = array<i64: 128, 128>}, {transform_indices = @transform_2, window_bounds = array<i64: 8, 128>}]} {
    %c0 = arith.constant 0 : index
    %c0_0 = arith.constant 0 : index
    %0 = vector.load %arg1[%c0, %c0_0] : memref<8x128xf32, #tpu.memory_space<vmem>>, vector<8x128xf32>
    %c0_1 = arith.constant 0 : index
    %c0_2 = arith.constant 0 : index
    %1 = vector.load %arg2[%c0_1, %c0_2] : memref<128x128xf32, #tpu.memory_space<vmem>>, vector<128x128xf32>
    %cst = arith.constant dense<0.000000e+00> : vector<8x128xf32>
    %2 = tpu.matmul %0, %1, %cst {dimension_numbers = #tpu.dot_dimension_numbers<[1], [0], [0], [1], [0, 0, 1, 1], [], []>} : vector<8x128xf32>, vector<128x128xf32>, vector<8x128xf32> -> vector<8x128xf32>
    %c0_3 = arith.constant 0 : index
    %c0_4 = arith.constant 0 : index
    %3 = vector.load %arg3[%c0_3, %c0_4] : memref<8x128xf32, #tpu.memory_space<vmem>>, vector<8x128xf32>
    tpu.vector_store %arg3[%c0_3, %c0_4], %2 {strides = array<i32>} : memref<8x128xf32, #tpu.memory_space<vmem>>, vector<8x128xf32>,
    return
  }
  func.func @transform_0(%arg0: i32) -> (i32, i32) {
    %c0_i32 = arith.constant 0 : i32
    %c0_i32_0 = arith.constant 0 : i32
    return %arg0, %c0_i32 : i32, i32
  }
  func.func @transform_1(%arg0: i32) -> (i32, i32) {
    %c0_i32 = arith.constant 0 : i32
    %c0_i32_0 = arith.constant 0 : i32
    %c0_i32_1 = arith.constant 0 : i32
    return %c0_i32, %c0_i32_0 : i32, i32
  }
  func.func @transform_2(%arg0: i32) -> (i32, i32) {
    %c0_i32 = arith.constant 0 : i32
    %c0_i32_0 = arith.constant 0 : i32
    return %arg0, %c0_i32 : i32, i32
  }
}

</mosaic_0001>

<bundles_post_ra>
// kernel: tpu_custom_call.1
= control target key start
LH: loop header
LB: loop body
LE: loop exit
PB: predicated region body
PF: predicated region fallthrough
CT: control target
= control target key end

     0   :  { %7 = vsyncpa [#allocation3], 0  ;;  %s210_s0 = inlined_call_operand.hbm [shape: f32[8,128], index: 0, kind: input, shape index: {}]   ;;  %s211_s1 = inlined_call_operand.hbm [shape: f32[128,128], index: 1, kind: input, shape index: {}]   ;;  %s212_s2 = inlined_call_operand.hbm [shape: f32[8,128], index: 2, kind: output, shape index: {}]  }
   0x1   :  { %8 = vsyncpa [#allocation6], 0 }
   0x2   :  { %9 = vsyncpa [#allocation4], 0  ;;  %s15_s11 = sshll.u32 %s210_s0, 4  ;;  %s181_s12 = smov [#allocation2]   ;;  %s16_s11 = int_to_ptr.hbm [resolvable:$true] %s15_s11 }
   0x3   :  { %s17_s13 = sshll.u32 %s181_s12, 4  ;;  %s25_s16 = sshll.u32 %s211_s1, 4  ;;  %s18_s13 = int_to_ptr.vmem [resolvable:$true] %s17_s13  ;;  %s26_s16 = int_to_ptr.hbm [resolvable:$true] %s25_s16 }
   0x4   :  { %20 = dma.hbm_to_vmem [thread:$0]  %s16_s11, 128, %s18_s13, [#allocation3]  }
   0x5   :  { %s182_s17 = smov [#allocation5]   ;;  %s183_s19 = smov 128  }
   0x6   :  { %s27_s18 = sshll.u32 %s182_s17, 4  ;;  %s184_s20 = smov 8   ;;  %s28_s18 = int_to_ptr.vmem [resolvable:$true] %s27_s18 }
   0x7   :  { %33 = dma.hbm_to_vmem [thread:$0]  %s26_s16, 2048, %s28_s18, [#allocation6], %s183_s19, %s183_s19, %s184_s20  }
   0x8   :  { %175 = dma.done.wait [#allocation3], 128  }
   0x9   :  { %176 = vsyncadd [#allocation3], 4294967168 }
   0xa   :  { %177 = dma.done.wait [#allocation6], 2048  }
   0xb   :  { %178 = vsyncadd [#allocation6], 4294965248  ;;  %v58_v0 = vld [vmem:[#allocation5 + $0x78] sm:$0xff]  ;;  %v57_v1 = vld [vmem:[#allocation5 + $0x70] sm:$0xff]  ;;  %s185_s0 = smov [#allocation7]   ;;  %s87_s23 = sshll.u32 %s212_s2, 4  ;;  %s88_s23 = int_to_ptr.hbm [resolvable:$true] %s87_s23 }
   0xc   :  { %59 = vmatpush.msra.mxu0 %v58_v0  ;;  %v56_v2 = vld [vmem:[#allocation5 + $0x68] sm:$0xff]  ;;  %v55_v3 = vld [vmem:[#allocation5 + $0x60] sm:$0xff]  ;;  %v54_v4 = vld [vmem:[#allocation5 + $0x58] sm:$0xff]  ;;  %s85_s1 = sshll.u32 %s185_s0, 4  ;;  %s86_s1 = int_to_ptr.vmem [resolvable:$true] %s85_s1 }
   0xd   :  { %v53_v5 = vld [vmem:[#allocation5 + $0x50] sm:$0xff]  ;;  %v52_v6 = vld [vmem:[#allocation5 + $0x48] sm:$0xff]  ;;  %v51_v7 = vld [vmem:[#allocation5 + $0x40] sm:$0xff] }
   0xe   :  { %60 = vmatpush.msra.mxu0 %v57_v1  ;;  %v50_v8 = vld [vmem:[#allocation5 + $0x38] sm:$0xff]  ;;  %v49_v9 = vld [vmem:[#allocation5 + $0x30] sm:$0xff]  ;;  %v48_v10 = vld [vmem:[#allocation5 + $0x28] sm:$0xff] }
   0xf   :  { %v47_v11 = vld [vmem:[#allocation5 + $0x20] sm:$0xff]  ;;  %v46_v12 = vld [vmem:[#allocation5 + $0x18] sm:$0xff]  ;;  %v45_v13 = vld [vmem:[#allocation5 + $0x10] sm:$0xff] }
  0x10   :  { %61 = vmatpush.msra.mxu0 %v56_v2  ;;  %v44_v14 = vld [vmem:[#allocation5 + $0x8] sm:$0xff]  ;;  %v43_v15 = vld [vmem:[#allocation5] sm:$0xff]  ;;  %v42_v16 = vld [vmem:[#allocation2] sm:$0xff] }
  0x12   :  { %62 = vmatpush.msra.mxu0 %v55_v3 }
  0x14   :  { %63 = vmatpush.msra.mxu0 %v54_v4 }
  0x16   :  { %64 = vmatpush.msra.mxu0 %v53_v5 }
  0x18   :  { %65 = vmatpush.msra.mxu0 %v52_v6 }
  0x1a   :  { %66 = vmatpush.msra.mxu0 %v51_v7 }
  0x1c   :  { %67 = vmatpush.msra.mxu0 %v50_v8 }
  0x1e   :  { %68 = vmatpush.msra.mxu0 %v49_v9 }
  0x20   :  { %69 = vmatpush.msra.mxu0 %v48_v10 }
  0x22   :  { %70 = vmatpush.msra.mxu0 %v47_v11 }
  0x24   :  { %71 = vmatpush.msra.mxu0 %v46_v12 }
  0x26   :  { %72 = vmatpush.msra.mxu0 %v45_v13 }
  0x28   :  { %73 = vmatpush.msra.mxu0 %v44_v14 }
  0x2a   :  { %74 = vmatpush.msra.mxu0 %v43_v15 }
  0x2b   :  { %75 = vmatmul.f32.vlgmr.msra.gmra.mxu0 %v42_v16 }
  0xa8   :  { %v76_v17 = vpop.f32.mrf.mxu0 }
  0xa9   :  { %79 = vst [vmem:[#allocation7] sm:$0xff] %v76_v17 }
  0xaa   :  { %90 = dma.vmem_to_hbm [thread:$0]  %s86_s1, 128, %s88_s23, [#allocation4]  }
  0xab   :  { %179 = dma.done.wait [#allocation4], 128  }
  0xac   :  { %180 = vsyncadd [#allocation4], 4294967168 }
  0xad   :  { %95 = vsyncpa [#allocation3], 1 }
  0xae   :  { %96 = vsyncpa [#allocation6], 1 }
  0xaf   :  { %97 = vsyncpa [#allocation4], 1 }

</bundles_post_ra>
